<compile_context>
chip_gen: v7x
topology: tpu7x:2x2x1
jax: 0.10.0
libtpu: 0.0.40
codegen_flags: <defaults>
</compile_context>

<pallas_src>
import math

import jax
import jax.numpy as jnp
from jax.experimental import pallas as pl
from jax.experimental.pallas import tpu as pltpu


def _round_up(x, m):
    return ((x + m - 1) // m) * m


def _pad_axis(a, axis, target):
    cur = a.shape[axis]
    if cur == target:
        return a
    pads = [(0, 0)] * a.ndim
    pads[axis] = (0, target - cur)
    return jnp.pad(a, pads)


def _pick_tile(dim, preferred, align):
    """Tile size: `preferred` if the dim is big enough, otherwise the dim
    rounded up to the hardware alignment (one block covers it)."""
    if dim >= preferred:
        return preferred
    return _round_up(dim, align)


def _lora_kernel(x_ref, wt_ref, b_ref, a_ref, bmat_ref, o_ref, acc_ref, xa_ref):
    # Grid: (i: M tiles, j: N tiles, k: K reduction tiles), k innermost.
    j = pl.program_id(1)
    k = pl.program_id(2)
    nk = pl.num_programs(2)

    @pl.when(k == 0)
    def _():
        acc_ref[...] = jnp.zeros_like(acc_ref)

    # x @ A only depends on the row tile i, so it is accumulated once (during
    # the j == 0 sweep over k) and reused for every other N tile of the same i.
    @pl.when((j == 0) & (k == 0))
    def _():
        xa_ref[...] = jnp.zeros_like(xa_ref)

    x = x_ref[...]

    # Base linear path: accumulate x_tile @ W^T_tile in f32.
    acc_ref[...] += jnp.dot(x, wt_ref[...], preferred_element_type=jnp.float32)

    @pl.when(j == 0)
    def _():
        xa_ref[...] += jnp.dot(x, a_ref[...],
                               preferred_element_type=jnp.float32)

    @pl.when(k == nk - 1)
    def _():
        # LoRA second matmul on the cached f32 (tm, rank_p) activation; keep
        # everything in f32 until the final cast for parity with the reference.
        lora = jnp.dot(xa_ref[...], bmat_ref[...].astype(jnp.float32),
                       preferred_element_type=jnp.float32)
        out = acc_ref[...] + b_ref[...].astype(jnp.float32) + lora
        o_ref[...] = out.astype(o_ref.dtype)


def lora_forward(x, wt, bias, A, B, *, tm_pref=256, tn_pref=256, tk_pref=512):
    """LoRA linear forward.

    x:    [..., in_features]
    wt:   [in_features, out_features]  (Linear weight, transposed ONCE at
                                        parameter-load time, not per call)
    bias: [out_features]
    A:    [in_features, rank]
    B:    [rank, out_features]
    Returns [..., out_features].
    """
    in_features, out_features = wt.shape
    rank = A.shape[1]
    lead = x.shape[:-1]

    x2d = x.reshape(-1, in_features)
    M = x2d.shape[0]

    # --- tile selection & zero padding to (8,128)-aligned, lane-dense tiles.
    tm = _pick_tile(M, tm_pref, 8)
    tn = _pick_tile(out_features, tn_pref, 128)
    tk = _pick_tile(in_features, tk_pref, 128)
    rank_p = _round_up(rank, 128)

    M_p = _round_up(M, tm)
    N_p = _round_up(out_features, tn)
    K_p = _round_up(in_features, tk)

    x_p = _pad_axis(_pad_axis(x2d, 0, M_p), 1, K_p)
    wt_p = _pad_axis(_pad_axis(wt, 0, K_p), 1, N_p)
    b_p = _pad_axis(bias.reshape(1, out_features), 1, N_p)
    a_p = _pad_axis(_pad_axis(A, 0, K_p), 1, rank_p)
    bm_p = _pad_axis(_pad_axis(B, 0, rank_p), 1, N_p)

    grid = (M_p // tm, N_p // tn, K_p // tk)

    # Advisory cost estimate (helps XLA schedule ops around the custom call).
    itemsize = jnp.dtype(x.dtype).itemsize
    flops = (2 * M * in_features * out_features
             + 2 * M * in_features * rank
             + 2 * M * rank * out_features)
    bytes_accessed = (x2d.size + wt.size + bias.size + A.size + B.size
                      + M * out_features) * itemsize
    cost = pl.CostEstimate(flops=flops, transcendentals=0,
                           bytes_accessed=bytes_accessed)

    # Scoped-VMEM budget: 2x double-buffered tiles + f32 accumulators, with
    # headroom; capped at 64 MiB so it is safe on v7x's smaller physical VMEM.
    tile_elems = (tm * tk + tk * tn + tn + tk * rank_p + rank_p * tn + tm * tn)
    vmem_need = 2 * tile_elems * itemsize + (tm * tn + tm * rank_p) * 4
    vmem_limit = int(min(max(2 * vmem_need, 32 * 1024 * 1024),
                         64 * 1024 * 1024))

    out_p = pl.pallas_call(
        _lora_kernel,
        out_shape=jax.ShapeDtypeStruct((M_p, N_p), x.dtype),
        grid_spec=pltpu.PrefetchScalarGridSpec(
            num_scalar_prefetch=0,
            grid=grid,
            in_specs=[
                pl.BlockSpec((tm, tk), lambda i, j, k: (i, k)),       # x
                pl.BlockSpec((tk, tn), lambda i, j, k: (k, j)),       # W^T
                pl.BlockSpec((1, tn), lambda i, j, k: (0, j)),        # bias
                pl.BlockSpec((tk, rank_p), lambda i, j, k: (k, 0)),   # A (padded)
                pl.BlockSpec((rank_p, tn), lambda i, j, k: (0, j)),   # B (padded)
            ],
            out_specs=pl.BlockSpec((tm, tn), lambda i, j, k: (i, j)),
            scratch_shapes=[
                pltpu.VMEM((tm, tn), jnp.float32),      # base-path accumulator
                pltpu.VMEM((tm, rank_p), jnp.float32),  # cached x @ A
            ],
        ),
        compiler_params=pltpu.CompilerParams(
            # k is the reduction; j carries the cached x@A scratch across
            # N tiles, so it must stay sequential too. Only M is parallel.
            dimension_semantics=("parallel", "arbitrary", "arbitrary"),
            vmem_limit_bytes=vmem_limit,
        ),
        cost_estimate=cost,
    )(x_p, wt_p, b_p, a_p, bm_p)

    out2d = out_p[:M, :out_features]
    return out2d.reshape(*lead, out_features)


def init_params(key, in_features, out_features, rank, dtype=jnp.float32):
    """Deterministic init matching the PyTorch module's __init__."""
    k_w, k_b, k_a = jax.random.split(key, 3)

    # nn.Linear default init: bound = 1/sqrt(fan_in), fan_in = in_features.
    w_bound = 1.0 / math.sqrt(in_features)
    w = jax.random.uniform(k_w, (out_features, in_features), dtype,
                           minval=-w_bound, maxval=w_bound)
    bias = jax.random.uniform(k_b, (out_features,), dtype,
                              minval=-w_bound, maxval=w_bound)

    # self.A: kaiming_uniform_(A, a=sqrt(5)) on (in, rank): bound = 1/sqrt(rank).
    a_bound = 1.0 / math.sqrt(rank)
    A = jax.random.uniform(k_a, (in_features, rank), dtype,
                           minval=-a_bound, maxval=a_bound)

    # self.B: zeros (standard LoRA init).
    B = jnp.zeros((rank, out_features), dtype)
    return w, bias, A, B


if __name__ == "__main__":
    key = jax.random.PRNGKey(0)
    k_x, k_p, k_x2, k_p2 = jax.random.split(key, 4)

    fwd = jax.jit(lora_forward)

    # --- Check 1: small shapes matching the module's typical test harness.
    batch, seq, in_features, out_features, rank = 2, 8, 32, 32, 4
    x = jax.random.normal(k_x, (batch, seq, in_features), jnp.float32)
    w, bias, A, B = init_params(k_p, in_features, out_features, rank)
    # Use a nonzero B so the LoRA path is actually exercised numerically.
    B = 0.05 * jax.random.normal(jax.random.PRNGKey(42), B.shape, B.dtype)

    wt = jnp.transpose(w)  # transpose ONCE at parameter-load time, not per call

    out = jax.block_until_ready(fwd(x, wt, bias, A, B))
    with jax.default_matmul_precision("highest"):
        ref = x @ w.T + bias + (x @ A) @ B
    assert out.shape == (batch, seq, out_features)
    assert jnp.allclose(out, ref, atol=1e-3, rtol=1e-3), \
        float(jnp.max(jnp.abs(out - ref)))

    # --- Check 2: unaligned / multi-tile shapes exercise the tiled path
    #     (2 K tiles, 2 N tiles, zero padding, cached x@A across N tiles).
    batch2, seq2, in2, out2, rank2 = 2, 24, 640, 384, 4
    x2 = jax.random.normal(k_x2, (batch2, seq2, in2), jnp.float32)
    w2, bias2, A2, B2 = init_params(k_p2, in2, out2, rank2)
    B2 = 0.05 * jax.random.normal(jax.random.PRNGKey(7), B2.shape, B2.dtype)
    wt2 = jnp.transpose(w2)

    out_b = jax.block_until_ready(fwd(x2, wt2, bias2, A2, B2))
    with jax.default_matmul_precision("highest"):
        ref_b = x2 @ w2.T + bias2 + (x2 @ A2) @ B2
    assert out_b.shape == (batch2, seq2, out2)
    assert jnp.allclose(out_b, ref_b, atol=2e-3, rtol=2e-3), \
        float(jnp.max(jnp.abs(out_b - ref_b)))

    print("KERNEL_OK")
</pallas_src>

<mosaic_0001>
module attributes {stable_mosaic.version = 11 : i64} {
  func.func @_lora_kernel(%arg0: i32, %arg1: i32, %arg2: i32, %arg3: memref<16x128xf32, #tpu.memory_space<vmem>>, %arg4: memref<128x128xf32, #tpu.memory_space<vmem>>, %arg5: memref<1x128xf32, #tpu.memory_space<vmem>>, %arg6: memref<128x128xf32, #tpu.memory_space<vmem>>, %arg7: memref<128x128xf32, #tpu.memory_space<vmem>>, %arg8: memref<16x128xf32, #tpu.memory_space<vmem>>, %arg9: memref<16x128xf32, #tpu.memory_space<vmem>>, %arg10: memref<16x128xf32, #tpu.memory_space<vmem>>) attributes {dimension_semantics = [#tpu.dimension_semantics<parallel>, #tpu.dimension_semantics<arbitrary>, #tpu.dimension_semantics<arbitrary>], iteration_bounds = array<i64: 1, 1, 1>, scalar_prefetch = 0 : i64, scratch_operands = 2 : i64, tpu.core_type = #tpu.core_type<tc>, window_params = [{transform_indices = @transform_0, window_bounds = array<i64: 16, 128>}, {transform_indices = @transform_1, window_bounds = array<i64: 128, 128>}, {transform_indices = @transform_2, window_bounds = array<i64: 1, 128>}, {transform_indices = @transform_3, window_bounds = array<i64: 128, 128>}, {transform_indices = @transform_4, window_bounds = array<i64: 128, 128>}, {transform_indices = @transform_5, window_bounds = array<i64: 16, 128>}]} {
    %c0_i32 = arith.constant 0 : i32
    %0 = arith.cmpi eq, %arg2, %c0_i32 : i32
    %1 = arith.extui %0 : i1 to i32
    %c0_i32_0 = arith.constant 0 : i32
    %2 = arith.cmpi ne, %1, %c0_i32_0 : i32
    scf.if %2 {
      %cst_15 = arith.constant 0.000000e+00 : f32
      %20 = vector.broadcast %cst_15 : f32 to vector<16x128xf32>
      %c0_16 = arith.constant 0 : index
      %c0_17 = arith.constant 0 : index
      %21 = vector.load %arg9[%c0_16, %c0_17] : memref<16x128xf32, #tpu.memory_space<vmem>>, vector<16x128xf32>
      tpu.vector_store %arg9[%c0_16, %c0_17], %20 {strides = array<i32>} : memref<16x128xf32, #tpu.memory_space<vmem>>, vector<16x128xf32>,
    } else {
    }
    %c0_i32_1 = arith.constant 0 : i32
    %3 = arith.cmpi eq, %arg1, %c0_i32_1 : i32
    %c0_i32_2 = arith.constant 0 : i32
    %4 = arith.cmpi eq, %arg2, %c0_i32_2 : i32
    %5 = arith.andi %3, %4 : i1
    %6 = arith.extui %5 : i1 to i32
    %c0_i32_3 = arith.constant 0 : i32
    %7 = arith.cmpi ne, %6, %c0_i32_3 : i32
    scf.if %7 {
      %cst_15 = arith.constant 0.000000e+00 : f32
      %20 = vector.broadcast %cst_15 : f32 to vector<16x128xf32>
      %c0_16 = arith.constant 0 : index
      %c0_17 = arith.constant 0 : index
      %21 = vector.load %arg10[%c0_16, %c0_17] : memref<16x128xf32, #tpu.memory_space<vmem>>, vector<16x128xf32>
      tpu.vector_store %arg10[%c0_16, %c0_17], %20 {strides = array<i32>} : memref<16x128xf32, #tpu.memory_space<vmem>>, vector<16x128xf32>,
    } else {
    }
    %c0 = arith.constant 0 : index
    %c0_4 = arith.constant 0 : index
    %8 = vector.load %arg3[%c0, %c0_4] : memref<16x128xf32, #tpu.memory_space<vmem>>, vector<16x128xf32>
    %c0_5 = arith.constant 0 : index
    %c0_6 = arith.constant 0 : index
    %9 = vector.load %arg9[%c0_5, %c0_6] : memref<16x128xf32, #tpu.memory_space<vmem>>, vector<16x128xf32>
    %c0_7 = arith.constant 0 : index
    %c0_8 = arith.constant 0 : index
    %10 = vector.load %arg4[%c0_7, %c0_8] : memref<128x128xf32, #tpu.memory_space<vmem>>, vector<128x128xf32>
    %cst = arith.constant dense<0.000000e+00> : vector<16x128xf32>
    %11 = tpu.matmul %8, %10, %cst {dimension_numbers = #tpu.dot_dimension_numbers<[1], [0], [0], [1], [0, 0, 1, 1], [], []>} : vector<16x128xf32>, vector<128x128xf32>, vector<16x128xf32> -> vector<16x128xf32>
    %12 = arith.addf %9, %11 : vector<16x128xf32>
    %c0_9 = arith.constant 0 : index
    %c0_10 = arith.constant 0 : index
    %13 = vector.load %arg9[%c0_9, %c0_10] : memref<16x128xf32, #tpu.memory_space<vmem>>, vector<16x128xf32>
    tpu.vector_store %arg9[%c0_9, %c0_10], %12 {strides = array<i32>} : memref<16x128xf32, #tpu.memory_space<vmem>>, vector<16x128xf32>,
    %c0_i32_11 = arith.constant 0 : i32
    %14 = arith.cmpi eq, %arg1, %c0_i32_11 : i32
    %15 = arith.extui %14 : i1 to i32
    %c0_i32_12 = arith.constant 0 : i32
    %16 = arith.cmpi ne, %15, %c0_i32_12 : i32
    scf.if %16 {
      %c0_15 = arith.constant 0 : index
      %c0_16 = arith.constant 0 : index
      %20 = vector.load %arg10[%c0_15, %c0_16] : memref<16x128xf32, #tpu.memory_space<vmem>>, vector<16x128xf32>
      %c0_17 = arith.constant 0 : index
      %c0_18 = arith.constant 0 : index
      %21 = vector.load %arg6[%c0_17, %c0_18] : memref<128x128xf32, #tpu.memory_space<vmem>>, vector<128x128xf32>
      %cst_19 = arith.constant dense<0.000000e+00> : vector<16x128xf32>
      %22 = tpu.matmul %8, %21, %cst_19 {dimension_numbers = #tpu.dot_dimension_numbers<[1], [0], [0], [1], [0, 0, 1, 1], [], []>} : vector<16x128xf32>, vector<128x128xf32>, vector<16x128xf32> -> vector<16x128xf32>
      %23 = arith.addf %20, %22 : vector<16x128xf32>
      %c0_20 = arith.constant 0 : index
      %c0_21 = arith.constant 0 : index
      %24 = vector.load %arg10[%c0_20, %c0_21] : memref<16x128xf32, #tpu.memory_space<vmem>>, vector<16x128xf32>
      tpu.vector_store %arg10[%c0_20, %c0_21], %23 {strides = array<i32>} : memref<16x128xf32, #tpu.memory_space<vmem>>, vector<16x128xf32>,
    } else {
    }
    %c0_i32_13 = arith.constant 0 : i32
    %17 = arith.cmpi eq, %arg2, %c0_i32_13 : i32
    %18 = arith.extui %17 : i1 to i32
    %c0_i32_14 = arith.constant 0 : i32
    %19 = arith.cmpi ne, %18, %c0_i32_14 : i32
    scf.if %19 {
      %c0_15 = arith.constant 0 : index
      %c0_16 = arith.constant 0 : index
      %20 = vector.load %arg10[%c0_15, %c0_16] : memref<16x128xf32, #tpu.memory_space<vmem>>, vector<16x128xf32>
      %c0_17 = arith.constant 0 : index
      %c0_18 = arith.constant 0 : index
      %21 = vector.load %arg7[%c0_17, %c0_18] : memref<128x128xf32, #tpu.memory_space<vmem>>, vector<128x128xf32>
      %cst_19 = arith.constant dense<0.000000e+00> : vector<16x128xf32>
      %22 = tpu.matmul %20, %21, %cst_19 {dimension_numbers = #tpu.dot_dimension_numbers<[1], [0], [0], [1], [0, 0, 1, 1], [], []>} : vector<16x128xf32>, vector<128x128xf32>, vector<16x128xf32> -> vector<16x128xf32>
      %c0_20 = arith.constant 0 : index
      %c0_21 = arith.constant 0 : index
      %23 = vector.load %arg9[%c0_20, %c0_21] : memref<16x128xf32, #tpu.memory_space<vmem>>, vector<16x128xf32>
      %c0_22 = arith.constant 0 : index
      %c0_23 = arith.constant 0 : index
      %24 = vector.load %arg5[%c0_22, %c0_23] : memref<1x128xf32, #tpu.memory_space<vmem>>, vector<1x128xf32>
      %25 = vector.broadcast %24 : vector<1x128xf32> to vector<16x128xf32>
      %26 = arith.addf %23, %25 : vector<16x128xf32>
      %27 = arith.addf %26, %22 : vector<16x128xf32>
      %c0_24 = arith.constant 0 : index
      %c0_25 = arith.constant 0 : index
      %28 = vector.load %arg8[%c0_24, %c0_25] : memref<16x128xf32, #tpu.memory_space<vmem>>, vector<16x128xf32>
      tpu.vector_store %arg8[%c0_24, %c0_25], %27 {strides = array<i32>} : memref<16x128xf32, #tpu.memory_space<vmem>>, vector<16x128xf32>,
    } else {
    }
    return
  }
  func.func @transform_0(%arg0: i32, %arg1: i32, %arg2: i32) -> (i32, i32) {
    %c0_i32 = arith.constant 0 : i32
    return %arg0, %arg2 : i32, i32
  }
  func.func @transform_1(%arg0: i32, %arg1: i32, %arg2: i32) -> (i32, i32) {
    %c0_i32 = arith.constant 0 : i32
    return %arg2, %arg1 : i32, i32
  }
  func.func @transform_2(%arg0: i32, %arg1: i32, %arg2: i32) -> (i32, i32) {
    %c0_i32 = arith.constant 0 : i32
    %c0_i32_0 = arith.constant 0 : i32
    return %c0_i32, %arg1 : i32, i32
  }
  func.func @transform_3(%arg0: i32, %arg1: i32, %arg2: i32) -> (i32, i32) {
    %c0_i32 = arith.constant 0 : i32
    %c0_i32_0 = arith.constant 0 : i32
    return %arg2, %c0_i32 : i32, i32
  }
  func.func @transform_4(%arg0: i32, %arg1: i32, %arg2: i32) -> (i32, i32) {
    %c0_i32 = arith.constant 0 : i32
    %c0_i32_0 = arith.constant 0 : i32
    return %c0_i32, %arg1 : i32, i32
  }
  func.func @transform_5(%arg0: i32, %arg1: i32, %arg2: i32) -> (i32, i32) {
    %c0_i32 = arith.constant 0 : i32
    return %arg0, %arg1 : i32, i32
  }
}

</mosaic_0001>

<bundles_post_ra>
// kernel: lora_forward.1
= control target key start
LH: loop header
LB: loop body
LE: loop exit
PB: predicated region body
PF: predicated region fallthrough
CT: control target
= control target key end

     0   :  { %s796_s3 = inlined_call_operand.vmem [shape: f32[128,128], index: 3, kind: input, shape index: {}]   ;;  %s797_s0 = inlined_call_operand.vmem [shape: f32[16,128], index: 0, kind: input, shape index: {}]   ;;  %s798_s1 = inlined_call_operand.vmem [shape: f32[128,128], index: 1, kind: input, shape index: {}]   ;;  %s799_s4 = inlined_call_operand.vmem [shape: f32[128,128], index: 4, kind: input, shape index: {}]   ;;  %s800_s2 = inlined_call_operand.vmem [shape: f32[1,128], index: 2, kind: input, shape index: {}]   ;;  %s801_s5 = inlined_call_operand.vmem [shape: f32[16,128], index: 5, kind: output, shape index: {}]  }
   0x1   :  { %v137_v0 = vld [vmem:[%s796_s3] sm:$0xff]  ;;  %v138_v1 = vld [vmem:[%s796_s3 + $0x8] sm:$0xff]  ;;  %v139_v2 = vld [vmem:[%s796_s3 + $0x10] sm:$0xff] }
   0x2   :  { %v539_v3 = vpack.c.bf16 %v138_v1, %v137_v0  ;;  %v140_v4 = vld [vmem:[%s796_s3 + $0x18] sm:$0xff]  ;;  %v141_v6 = vld [vmem:[%s796_s3 + $0x20] sm:$0xff]  ;;  %v142_v7 = vld [vmem:[%s796_s3 + $0x28] sm:$0xff] }
   0x3   :  { %v543_v5 = vpack.c.bf16 %v140_v4, %v139_v2  ;;  %v547_v8 = vpack.c.bf16 %v142_v7, %v141_v6  ;;  %v143_v9 = vld [vmem:[%s796_s3 + $0x30] sm:$0xff]  ;;  %v144_v10 = vld [vmem:[%s796_s3 + $0x38] sm:$0xff]  ;;  %v33_v11 = vld [vmem:[%s797_s0] sm:$0xff] }
   0x4   :  { %540 = vmatprep.subr.bf16.mxu1 %v539_v3  ;;  %469 = vmatprep.mubr.f32.mxu1 %v33_v11  ;;  %v37_v12 = vld [vmem:[%s798_s1] sm:$0xff]  ;;  %v38_v13 = vld [vmem:[%s798_s1 + $0x8] sm:$0xff]  ;;  %v39_v14 = vld [vmem:[%s798_s1 + $0x10] sm:$0xff]  ;;  %v551_v20 = vpack.c.bf16 %v144_v10, %v143_v9 }
   0x5   :  { %542 = vmatpush3.bf16.msra.mxu1 %v539_v3  ;;  %434 = vmatprep.mubr.f32.mxu0 %v33_v11  ;;  %v507_v15 = vpack.c.bf16 %v38_v13, %v37_v12  ;;  %v40_v16 = vld [vmem:[%s798_s1 + $0x18] sm:$0xff]  ;;  %v41_v18 = vld [vmem:[%s798_s1 + $0x20] sm:$0xff]  ;;  %v42_v19 = vld [vmem:[%s798_s1 + $0x28] sm:$0xff] }
   0x6   :  { %544 = vmatprep.subr.bf16.mxu1 %v543_v5  ;;  %v511_v17 = vpack.c.bf16 %v40_v16, %v39_v14  ;;  %v145_v21 = vld [vmem:[%s796_s3 + $0x40] sm:$0xff]  ;;  %v146_v22 = vld [vmem:[%s796_s3 + $0x48] sm:$0xff]  ;;  %v515_v23 = vpack.c.bf16 %v42_v19, %v41_v18  ;;  %v43_v24 = vld [vmem:[%s798_s1 + $0x30] sm:$0xff] }
   0x7   :  { %508 = vmatprep.subr.bf16.mxu0 %v507_v15  ;;  %v44_v25 = vld [vmem:[%s798_s1 + $0x38] sm:$0xff]  ;;  %v555_v26 = vpack.c.bf16 %v146_v22, %v145_v21  ;;  %v147_v27 = vld [vmem:[%s796_s3 + $0x50] sm:$0xff]  ;;  %v45_v30 = vld [vmem:[%s798_s1 + $0x40] sm:$0xff] }
   0x8   :  { %510 = vmatpush3.bf16.msra.mxu0 %v507_v15  ;;  %v148_v28 = vld [vmem:[%s796_s3 + $0x58] sm:$0xff]  ;;  %v519_v29 = vpack.c.bf16 %v44_v25, %v43_v24  ;;  %v46_v31 = vld [vmem:[%s798_s1 + $0x48] sm:$0xff]  ;;  %v149_v33 = vld [vmem:[%s796_s3 + $0x60] sm:$0xff] }
   0x9   :  { %546 = vmatpush3.bf16.msra.mxu1 %v543_v5  ;;  %512 = vmatprep.subr.bf16.mxu0 %v511_v17  ;;  %v559_v32 = vpack.c.bf16 %v148_v28, %v147_v27  ;;  %v150_v34 = vld [vmem:[%s796_s3 + $0x68] sm:$0xff]  ;;  %v523_v35 = vpack.c.bf16 %v46_v31, %v45_v30  ;;  %v47_v36 = vld [vmem:[%s798_s1 + $0x50] sm:$0xff]  ;;  %v48_v37 = vld [vmem:[%s798_s1 + $0x58] sm:$0xff] }
   0xa   :  { %548 = vmatprep.subr.bf16.mxu1 %v547_v8  ;;  %v563_v38 = vpack.c.bf16 %v150_v34, %v149_v33  ;;  %v151_v39 = vld [vmem:[%s796_s3 + $0x70] sm:$0xff]  ;;  %v152_v40 = vld [vmem:[%s796_s3 + $0x78] sm:$0xff]  ;;  %v527_v41 = vpack.c.bf16 %v48_v37, %v47_v36  ;;  %v49_v42 = vld [vmem:[%s798_s1 + $0x60] sm:$0xff] }
   0xb   :  { %v50_v43 = vld [vmem:[%s798_s1 + $0x68] sm:$0xff]  ;;  %v567_v44 = vpack.c.bf16 %v152_v40, %v151_v39  ;;  %v51_v46 = vld [vmem:[%s798_s1 + $0x70] sm:$0xff]  ;;  %v52_v47 = vld [vmem:[%s798_s1 + $0x78] sm:$0xff] }
   0xc   :  { %514 = vmatpush3.bf16.msra.mxu0 %v511_v17  ;;  %v531_v45 = vpack.c.bf16 %v50_v43, %v49_v42  ;;  %v535_v48 = vpack.c.bf16 %v52_v47, %v51_v46  ;;  %v34_v49 = vld [vmem:[%s797_s0 + $0x8] sm:$0xff]  ;;  %v237_v50 = vld [vmem:[%s799_s4] sm:$0xff]  ;;  %v239_v53 = vld [vmem:[%s799_s4 + $0x10] sm:$0xff] }
   0xd   :  { %550 = vmatpush3.bf16.msra.mxu1 %v547_v8  ;;  %516 = vmatprep.subr.bf16.mxu0 %v515_v23  ;;  %v238_v51 = vld [vmem:[%s799_s4 + $0x8] sm:$0xff]  ;;  %v240_v54 = vld [vmem:[%s799_s4 + $0x18] sm:$0xff]  ;;  %v241_v56 = vld [vmem:[%s799_s4 + $0x20] sm:$0xff] }
   0xe   :  { %552 = vmatprep.subr.bf16.mxu1 %v551_v20  ;;  %v571_v52 = vpack.c.bf16 %v238_v51, %v237_v50  ;;  %v575_v55 = vpack.c.bf16 %v240_v54, %v239_v53  ;;  %v242_v57 = vld [vmem:[%s799_s4 + $0x28] sm:$0xff]  ;;  %v243_v59 = vld [vmem:[%s799_s4 + $0x30] sm:$0xff]  ;;  %v244_v60 = vld [vmem:[%s799_s4 + $0x38] sm:$0xff] }
   0xf   :  { %v579_v58 = vpack.c.bf16 %v242_v57, %v241_v56  ;;  %v583_v61 = vpack.c.bf16 %v244_v60, %v243_v59  ;;  %v245_v62 = vld [vmem:[%s799_s4 + $0x40] sm:$0xff]  ;;  %v246_v63 = vld [vmem:[%s799_s4 + $0x48] sm:$0xff]  ;;  %v247_v1 = vld [vmem:[%s799_s4 + $0x50] sm:$0xff] }
  0x10   :  { %518 = vmatpush3.bf16.msra.mxu0 %v515_v23  ;;  %v587_v0 = vpack.c.bf16 %v246_v63, %v245_v62  ;;  %v248_v2 = vld [vmem:[%s799_s4 + $0x58] sm:$0xff]  ;;  %v249_v4 = vld [vmem:[%s799_s4 + $0x60] sm:$0xff]  ;;  %v250_v5 = vld [vmem:[%s799_s4 + $0x68] sm:$0xff] }
  0x11   :  { %554 = vmatpush3.bf16.msra.mxu1 %v551_v20  ;;  %520 = vmatprep.subr.bf16.mxu0 %v519_v29  ;;  %v591_v3 = vpack.c.bf16 %v248_v2, %v247_v1  ;;  %v595_v6 = vpack.c.bf16 %v250_v5, %v249_v4  ;;  %v251_v7 = vld [vmem:[%s799_s4 + $0x70] sm:$0xff]  ;;  %v252_v8 = vld [vmem:[%s799_s4 + $0x78] sm:$0xff]  ;;  %v347_v12 = vld [vmem:[%s800_s2] ss:$0 sm:$0xff] }
  0x12   :  { %556 = vmatprep.subr.bf16.mxu1 %v555_v26  ;;  %v599_v9 = vpack.c.bf16 %v252_v8, %v251_v7 }
  0x14   :  { %522 = vmatpush3.bf16.msra.mxu0 %v519_v29 }
  0x15   :  { %558 = vmatpush3.bf16.msra.mxu1 %v555_v26  ;;  %524 = vmatprep.subr.bf16.mxu0 %v523_v35 }
  0x16   :  { %560 = vmatprep.subr.bf16.mxu1 %v559_v32 }
  0x18   :  { %526 = vmatpush3.bf16.msra.mxu0 %v523_v35 }
  0x19   :  { %562 = vmatpush3.bf16.msra.mxu1 %v559_v32  ;;  %528 = vmatprep.subr.bf16.mxu0 %v527_v41 }
  0x1a   :  { %564 = vmatprep.subr.bf16.mxu1 %v563_v38 }
  0x1c   :  { %530 = vmatpush3.bf16.msra.mxu0 %v527_v41 }
  0x1d   :  { %566 = vmatpush3.bf16.msra.mxu1 %v563_v38  ;;  %532 = vmatprep.subr.bf16.mxu0 %v531_v45 }
  0x1e   :  { %568 = vmatprep.subr.bf16.mxu1 %v567_v44 }
  0x20   :  { %534 = vmatpush3.bf16.msra.mxu0 %v531_v45 }
  0x21   :  { %570 = vmatpush3.bf16.msra.mxu1 %v567_v44  ;;  %536 = vmatprep.subr.bf16.mxu0 %v535_v48 }
  0x24   :  { %470 = vmatmul.mubr.f32.vlgmr.msra.gmra.mrb[0].mxu1 %v34_v49  ;;  %538 = vmatpush3.bf16.msra.mxu0 %v535_v48 }
  0x25   :  { %572 = vmatprep.subr.bf16.mxu0 %v571_v52 }
  0x27   :  { %435 = vmatmul.mubr.f32.vlgmr.msra.gmra.mrb[0].mxu0 %v34_v49 }
  0x28   :  { %574 = vmatpush3.bf16.msra.mxu0 %v571_v52 }
  0x29   :  { %576 = vmatprep.subr.bf16.mxu0 %v575_v55 }
  0x2c   :  { %578 = vmatpush3.bf16.msra.mxu0 %v575_v55 }
  0x2d   :  { %580 = vmatprep.subr.bf16.mxu0 %v579_v58 }
  0x30   :  { %582 = vmatpush3.bf16.msra.mxu0 %v579_v58 }
  0x31   :  { %584 = vmatprep.subr.bf16.mxu0 %v583_v61 }
  0x34   :  { %586 = vmatpush3.bf16.msra.mxu0 %v583_v61 }
  0x35   :  { %588 = vmatprep.subr.bf16.mxu0 %v587_v0 }
  0x38   :  { %590 = vmatpush3.bf16.msra.mxu0 %v587_v0 }
  0x39   :  { %592 = vmatprep.subr.bf16.mxu0 %v591_v3 }
  0x3c   :  { %594 = vmatpush3.bf16.msra.mxu0 %v591_v3 }
  0x3d   :  { %596 = vmatprep.subr.bf16.mxu0 %v595_v6 }
  0x40   :  { %598 = vmatpush3.bf16.msra.mxu0 %v595_v6 }
  0x41   :  { %600 = vmatprep.subr.bf16.mxu0 %v599_v9 }
  0x44   :  { %602 = vmatpush3.bf16.msra.mxu0 %v599_v9 }
  0xf7   :  { %v471_v10 = vpop.f32.mrb[0].mxu1 }
  0xf8   :  { %v219_v11 = vpop.f32.mrb[1].mxu1 }
  0xf9   :  { %504 = vmatprep.mubr.f32.mxu0 %v219_v11 }
  0xfa   :  { %505 = vmatmul.mubr.f32.vlgmr.msra.gmra.mrb[0].mxu0 %v471_v10 }
 0x1cd   :  { %v506_v13 = vpop.f32.mrb[0].mxu0 }
 0x1ce   :  { %v603_v14 = vadd.f32 %v506_v13, %v347_v12  ;;  %v319_v15 = vpop.f32.mrb[1].mxu0 }
 0x1cf   :  { %v604_v16 = vadd.f32 %v347_v12, %v319_v15 }
 0x1d0   :  { %342 = vst [vmem:[%s801_s5 + $0x8] sm:$0xff] %v603_v14 }
 0x1d1   :  { %341 = vst [vmem:[%s801_s5] sm:$0xff] %v604_v16 }

</bundles_post_ra>
